<compile_context>
chip_gen: v5e
topology: v5e:2x2
jax: 0.10.0
libtpu: 0.0.40
codegen_flags: <defaults>
</compile_context>

<pallas_src>
import functools

import jax
import jax.numpy as jnp
from jax.experimental import pallas as pl
from jax.experimental.pallas import tpu as pltpu


def _round_up(x, m):
    return ((x + m - 1) // m) * m


def _round_down(x, m):
    return max(m, (x // m) * m)


def _usable_vmem_bytes():
    """Per-core VMEM capacity minus ~15% headroom; conservative fallback."""
    phys = None
    try:
        phys = getattr(pltpu.get_tpu_info(), "vmem_capacity_bytes", None)
    except Exception:
        phys = None
    if not phys:
        phys = 64 * 1024 * 1024  # v7x per-TC capacity — smallest in the fleet
    return int(phys * 0.85)


def _vmem_budget(tm, tk, n_pad, x_item, w_item, out_item):
    """Honest VMEM estimate: default double-buffering on every input/output
    block plus the f32 accumulator and the f32 LayerNorm intermediates."""
    return (2 * tk * n_pad * w_item        # weight tile (double-buffered)
            + 2 * 3 * n_pad * 4            # packed bias/gamma/beta (double-buffered)
            + 2 * tm * tk * x_item         # x tiles (double-buffered)
            + 2 * tm * n_pad * out_item    # out tiles (double-buffered)
            + tm * n_pad * 4               # f32 accumulator scratch
            + 3 * tm * n_pad * 4)          # f32 epilogue intermediates (y, d, ...)


def _projection_block_kernel(n_real, n_extra, alpha_ref, x_ref, w_ref,
                             params_ref, o_ref, acc_ref):
    # Grid = (row_tiles, k_tiles).  x_ref: (TM, TK), w_ref: (TK, Npad),
    # params_ref: (3, Npad) = [bias; gamma; beta], alpha_ref: (1, 1) in SMEM,
    # acc_ref: (TM, Npad) f32 scratch.  n_real = out_features,
    # n_extra = Npad - out_features (static Python floats).
    k = pl.program_id(1)

    @pl.when(k == 0)
    def _():
        acc_ref[...] = jnp.zeros_like(acc_ref)

    acc_ref[...] += jnp.dot(x_ref[...], w_ref[...],
                            preferred_element_type=jnp.float32)

    @pl.when(k == pl.num_programs(1) - 1)
    def _():
        prm = params_ref[...]
        y = acc_ref[...] + prm[0:1, :]                      # bias
        alpha = alpha_ref[0, 0]
        y = jnp.where(y >= 0.0, y, alpha * y)               # PReLU (shared alpha)

        # LayerNorm with centered statistics over the n_real real columns.
        # Padded columns hold exactly 0 (zero weight/bias), so they add
        # nothing to sum(y) and each adds mean^2 to sum((y-mean)^2);
        # subtract that correction.
        inv_n = 1.0 / n_real
        mean = jnp.sum(y, axis=-1, keepdims=True) * inv_n
        d = y - mean
        var = (jnp.sum(d * d, axis=-1, keepdims=True)
               - n_extra * (mean * mean)) * inv_n
        var = jnp.maximum(var, 0.0)
        inv = jax.lax.rsqrt(var + 1e-5)
        o_ref[...] = (d * inv * prm[1:2, :] + prm[2:3, :]).astype(o_ref.dtype)


def projection_block(x, w, b, alpha, gamma, beta, *, tm=512, tk=None):
    """Linear(in->out) -> PReLU -> LayerNorm(out).  x: (..., in_features)."""
    in_features = x.shape[-1]
    out_features = w.shape[1]
    lead_shape = x.shape[:-1]

    x2d = x.reshape(-1, in_features)
    M, K = x2d.shape

    # Feed the MXU in the activation dtype (native bf16/fp8 path on v6e/v7x);
    # accumulation stays f32 via preferred_element_type.
    if jnp.dtype(x2d.dtype).itemsize < jnp.dtype(w.dtype).itemsize:
        w = w.astype(x2d.dtype)

    x_item = jnp.dtype(x2d.dtype).itemsize
    w_item = jnp.dtype(w.dtype).itemsize
    out_item = x_item

    # Lane-dense output: pad the feature axis to a multiple of 128 with zero
    # parameter columns (LN statistics stay exact, see kernel).
    n_pad = _round_up(out_features, 128)

    cap = _usable_vmem_bytes()

    # Row tile: sublane-aligned for the activation dtype; rows are never
    # padded/copied — a cdiv grid handles the partial tail tile.
    sub = {4: 8, 2: 16, 1: 32}.get(x_item, 8)
    tm = max(sub, min(_round_up(tm, sub), _round_up(M, sub)))
    # Give the row axis >= 2 grid steps so both TensorCores engage on v7x.
    if M > sub and pl.cdiv(M, tm) < 2:
        tm = _round_up(pl.cdiv(M, 2), sub)
    # Shrink tm until the honest budget fits with the full-K resident weight.
    while tm > sub and _vmem_budget(tm, K, n_pad, x_item, w_item, out_item) > cap:
        new_tm = _round_down(tm // 2, sub)
        if new_tm == tm:
            break
        tm = new_tm

    # K-reduction tiling: only when the (K, n_pad) weight (+ double buffers)
    # cannot stay resident in VMEM (e.g. large layers on v7x's 64 MiB).
    if tk is None:
        tk = K
        if _vmem_budget(tm, K, n_pad, x_item, w_item, out_item) > cap and K > 128:
            tk = 128
            while (tk * 2 <= K and
                   _vmem_budget(tm, tk * 2, n_pad, x_item, w_item, out_item) <= cap):
                tk *= 2
    tk = min(tk, K)

    k_pad = _round_up(K, tk)
    if k_pad != K:
        # Rare fallback (huge, non-tk-aligned K): zero-pad the contraction axis.
        x2d = jnp.pad(x2d, ((0, 0), (0, k_pad - K)))

    # Parameters: weight in the MXU dtype; bias/gamma/beta packed into one
    # (3, n_pad) f32 block (single resident DMA instead of three).
    w_p = jnp.zeros((k_pad, n_pad), w.dtype).at[:K, :out_features].set(w)
    params = (jnp.zeros((3, n_pad), jnp.float32)
              .at[0, :out_features].set(b.astype(jnp.float32))
              .at[1, :out_features].set(gamma.astype(jnp.float32))
              .at[2, :out_features].set(beta.astype(jnp.float32)))
    alpha2d = jnp.asarray(alpha, jnp.float32).reshape(1, 1)

    grid = (pl.cdiv(M, tm), k_pad // tk)

    kernel = functools.partial(_projection_block_kernel,
                               float(out_features),
                               float(n_pad - out_features))

    out = pl.pallas_call(
        kernel,
        out_shape=jax.ShapeDtypeStruct((M, n_pad), x2d.dtype),
        grid_spec=pltpu.PrefetchScalarGridSpec(
            num_scalar_prefetch=0,
            grid=grid,
            in_specs=[
                # PReLU alpha: tiny scalar in SMEM.
                pl.BlockSpec(memory_space=pltpu.MemorySpace.SMEM),
                # row x K tile of the input
                pl.BlockSpec((tm, tk), lambda i, k: (i, k)),
                # weight K-tile (resident when k_tiles == 1)
                pl.BlockSpec((tk, n_pad), lambda i, k: (k, 0)),
                # packed bias / gamma / beta
                pl.BlockSpec((3, n_pad), lambda i, k: (0, 0)),
            ],
            out_specs=pl.BlockSpec((tm, n_pad), lambda i, k: (i, 0)),
            scratch_shapes=[pltpu.VMEM((tm, n_pad), jnp.float32)],
        ),
        compiler_params=pltpu.CompilerParams(
            dimension_semantics=("parallel", "arbitrary"),
            vmem_limit_bytes=cap,
        ),
        cost_estimate=pl.CostEstimate(
            flops=2 * M * k_pad * n_pad,
            bytes_accessed=(M * k_pad * x_item + k_pad * n_pad * w_item
                            + M * n_pad * out_item),
            transcendentals=M,
        ),
    )(alpha2d, x2d, w_p, params)

    if n_pad != out_features:
        out = out[:, :out_features]
    return out.reshape(*lead_shape, out_features)


def reference(x, w, b, alpha, gamma, beta):
    y = jnp.einsum("...k,kn->...n", x, w) + b
    y = jnp.where(y >= 0, y, alpha * y)
    mean = jnp.mean(y, axis=-1, keepdims=True)
    var = jnp.mean((y - mean) ** 2, axis=-1, keepdims=True)
    y = (y - mean) * jax.lax.rsqrt(var + 1e-5)
    return y * gamma + beta


def _make_params(key, in_features, out_features):
    k2, k3, k4, k5 = jax.random.split(key, 4)
    bound = 1.0 / (in_features ** 0.5)
    w = jax.random.uniform(k2, (in_features, out_features), jnp.float32, -bound, bound)
    b = jax.random.uniform(k3, (out_features,), jnp.float32, -bound, bound)
    alpha = jnp.float32(0.25)  # nn.PReLU() default single parameter
    gamma = 1.0 + 0.1 * jax.random.normal(k4, (out_features,), jnp.float32)
    beta = 0.1 * jax.random.normal(k5, (out_features,), jnp.float32)
    return w, b, alpha, gamma, beta


if __name__ == "__main__":
    key = jax.random.PRNGKey(0)
    batch, seq = 2, 8

    # Test 1: small projection (resident weight, single K step, padded columns).
    in_f, out_f = 32, 64
    k1, kp1, k2x, kp2 = jax.random.split(key, 4)
    x1 = jax.random.normal(k1, (batch, seq, in_f), jnp.float32)
    w1, b1, a1, g1, be1 = _make_params(kp1, in_f, out_f)
    out1 = jax.block_until_ready(projection_block(x1, w1, b1, a1, g1, be1))
    ref1 = reference(x1, w1, b1, a1, g1, be1)
    assert out1.shape == (batch, seq, out_f)
    assert jnp.allclose(out1, ref1, atol=1e-4, rtol=1e-4), \
        float(jnp.max(jnp.abs(out1 - ref1)))

    # Test 2: exercise the K-tiled accumulator path (forced tk < K) and the
    # slice-free fast path (out_features already a multiple of 128).
    in_f2, out_f2 = 256, 128
    x2 = jax.random.normal(k2x, (batch, seq, in_f2), jnp.float32)
    w2, b2, a2, g2, be2 = _make_params(kp2, in_f2, out_f2)
    out2 = jax.block_until_ready(
        projection_block(x2, w2, b2, a2, g2, be2, tk=128))
    ref2 = reference(x2, w2, b2, a2, g2, be2)
    assert out2.shape == (batch, seq, out_f2)
    assert jnp.allclose(out2, ref2, atol=1e-4, rtol=1e-4), \
        float(jnp.max(jnp.abs(out2 - ref2)))

    print("KERNEL_OK")
</pallas_src>

<mosaic_0001>
module attributes {stable_mosaic.version = 11 : i64} {
  func.func @_projection_block_kernel(%arg0: i32, %arg1: i32, %arg2: memref<1x1xf32, #tpu.memory_space<smem>>, %arg3: memref<8x32xf32, #tpu.memory_space<vmem>>, %arg4: memref<32x128xf32, #tpu.memory_space<vmem>>, %arg5: memref<3x128xf32, #tpu.memory_space<vmem>>, %arg6: memref<8x128xf32, #tpu.memory_space<vmem>>, %arg7: memref<8x128xf32, #tpu.memory_space<vmem>>) attributes {dimension_semantics = [#tpu.dimension_semantics<parallel>, #tpu.dimension_semantics<arbitrary>], iteration_bounds = array<i64: 2, 1>, scalar_prefetch = 0 : i64, scratch_operands = 1 : i64, tpu.core_type = #tpu.core_type<tc>, window_params = [{transform_indices = @transform_0, window_bounds = array<i64: 1, 1>}, {transform_indices = @transform_1, window_bounds = array<i64: 8, 32>}, {transform_indices = @transform_2, window_bounds = array<i64: 32, 128>}, {pipeline_mode = #tpu.pipeline_mode<synchronous>, transform_indices = @transform_3, window_bounds = array<i64: 3, 128>}, {transform_indices = @transform_4, window_bounds = array<i64: 8, 128>}]} {
    %c0_i32 = arith.constant 0 : i32
    %0 = arith.cmpi eq, %arg1, %c0_i32 : i32
    %1 = arith.extui %0 : i1 to i32
    %c0_i32_0 = arith.constant 0 : i32
    %2 = arith.cmpi ne, %1, %c0_i32_0 : i32
    scf.if %2 {
      %cst_10 = arith.constant 0.000000e+00 : f32
      %12 = vector.broadcast %cst_10 : f32 to vector<8x128xf32>
      %c0_11 = arith.constant 0 : index
      %c0_12 = arith.constant 0 : index
      %13 = vector.load %arg7[%c0_11, %c0_12] : memref<8x128xf32, #tpu.memory_space<vmem>>, vector<8x128xf32>
      tpu.vector_store %arg7[%c0_11, %c0_12], %12 {strides = array<i32>} : memref<8x128xf32, #tpu.memory_space<vmem>>, vector<8x128xf32>,
    } else {
    }
    %c0 = arith.constant 0 : index
    %c0_1 = arith.constant 0 : index
    %3 = vector.load %arg7[%c0, %c0_1] : memref<8x128xf32, #tpu.memory_space<vmem>>, vector<8x128xf32>
    %c0_2 = arith.constant 0 : index
    %c0_3 = arith.constant 0 : index
    %4 = vector.load %arg3[%c0_2, %c0_3] : memref<8x32xf32, #tpu.memory_space<vmem>>, vector<8x32xf32>
    %c0_4 = arith.constant 0 : index
    %c0_5 = arith.constant 0 : index
    %5 = vector.load %arg4[%c0_4, %c0_5] : memref<32x128xf32, #tpu.memory_space<vmem>>, vector<32x128xf32>
    %cst = arith.constant dense<0.000000e+00> : vector<8x128xf32>
    %6 = tpu.matmul %4, %5, %cst {dimension_numbers = #tpu.dot_dimension_numbers<[1], [0], [0], [1], [0, 0, 1, 1], [], []>} : vector<8x32xf32>, vector<32x128xf32>, vector<8x128xf32> -> vector<8x128xf32>
    %7 = arith.addf %3, %6 : vector<8x128xf32>
    %c0_6 = arith.constant 0 : index
    %c0_7 = arith.constant 0 : index
    %8 = vector.load %arg7[%c0_6, %c0_7] : memref<8x128xf32, #tpu.memory_space<vmem>>, vector<8x128xf32>
    tpu.vector_store %arg7[%c0_6, %c0_7], %7 {strides = array<i32>} : memref<8x128xf32, #tpu.memory_space<vmem>>, vector<8x128xf32>,
    %c0_i32_8 = arith.constant 0 : i32
    %9 = arith.cmpi eq, %arg1, %c0_i32_8 : i32
    %10 = arith.extui %9 : i1 to i32
    %c0_i32_9 = arith.constant 0 : i32
    %11 = arith.cmpi ne, %10, %c0_i32_9 : i32
    scf.if %11 {
      %c0_10 = arith.constant 0 : index
      %c0_11 = arith.constant 0 : index
      %12 = vector.load %arg5[%c0_10, %c0_11] : memref<3x128xf32, #tpu.memory_space<vmem>>, vector<3x128xf32>
      %c0_12 = arith.constant 0 : index
      %c0_13 = arith.constant 0 : index
      %13 = vector.load %arg7[%c0_12, %c0_13] : memref<8x128xf32, #tpu.memory_space<vmem>>, vector<8x128xf32>
      %14 = vector.extract_strided_slice %12 {offsets = [0, 0], sizes = [1, 128], strides = [1, 1]} : vector<3x128xf32> to vector<1x128xf32>
      %15 = vector.broadcast %14 : vector<1x128xf32> to vector<8x128xf32>
      %16 = arith.addf %13, %15 : vector<8x128xf32>
      %c0_14 = arith.constant 0 : index
      %c0_15 = arith.constant 0 : index
      %17 = memref.load %arg2[%c0_14, %c0_15] : memref<1x1xf32, #tpu.memory_space<smem>>
      %cst_16 = arith.constant 0.000000e+00 : f32
      %18 = vector.broadcast %cst_16 : f32 to vector<8x128xf32>
      %19 = arith.cmpf oge, %16, %18 : vector<8x128xf32>
      %20 = vector.broadcast %17 : f32 to vector<8x128xf32>
      %21 = arith.mulf %20, %16 : vector<8x128xf32>
      %22 = arith.select %19, %16, %21 : vector<8x128xi1>, vector<8x128xf32>
      %cst_17 = arith.constant dense<0.000000e+00> : vector<8xf32>
      %23 = vector.multi_reduction <add>, %22, %cst_17 [1] : vector<8x128xf32> to vector<8xf32>
      %24 = vector.shape_cast %23 : vector<8xf32> to vector<8x1xf32>
      %cst_18 = arith.constant 1.562500e-02 : f32
      %25 = vector.broadcast %cst_18 : f32 to vector<8x1xf32>
      %26 = arith.mulf %24, %25 : vector<8x1xf32>
      %27 = vector.broadcast %26 : vector<8x1xf32> to vector<8x128xf32>
      %28 = arith.subf %22, %27 : vector<8x128xf32>
      %29 = arith.mulf %28, %28 : vector<8x128xf32>
      %cst_19 = arith.constant dense<0.000000e+00> : vector<8xf32>
      %30 = vector.multi_reduction <add>, %29, %cst_19 [1] : vector<8x128xf32> to vector<8xf32>
      %31 = vector.shape_cast %30 : vector<8xf32> to vector<8x1xf32>
      %32 = arith.mulf %26, %26 : vector<8x1xf32>
      %cst_20 = arith.constant 6.400000e+01 : f32
      %33 = vector.broadcast %cst_20 : f32 to vector<8x1xf32>
      %34 = arith.mulf %33, %32 : vector<8x1xf32>
      %35 = arith.subf %31, %34 : vector<8x1xf32>
      %cst_21 = arith.constant 1.562500e-02 : f32
      %36 = vector.broadcast %cst_21 : f32 to vector<8x1xf32>
      %37 = arith.mulf %35, %36 : vector<8x1xf32>
      %cst_22 = arith.constant 0.000000e+00 : f32
      %38 = vector.broadcast %cst_22 : f32 to vector<8x1xf32>
      %39 = arith.maximumf %37, %38 : vector<8x1xf32>
      %cst_23 = arith.constant 9.99999974E-6 : f32
      %40 = vector.broadcast %cst_23 : f32 to vector<8x1xf32>
      %41 = arith.addf %39, %40 : vector<8x1xf32>
      %42 = math.rsqrt %41 : vector<8x1xf32>
      %43 = vector.broadcast %42 : vector<8x1xf32> to vector<8x128xf32>
      %44 = arith.mulf %28, %43 : vector<8x128xf32>
      %45 = vector.extract_strided_slice %12 {offsets = [1, 0], sizes = [1, 128], strides = [1, 1]} : vector<3x128xf32> to vector<1x128xf32>
      %46 = vector.broadcast %45 : vector<1x128xf32> to vector<8x128xf32>
      %47 = arith.mulf %44, %46 : vector<8x128xf32>
      %48 = vector.extract_strided_slice %12 {offsets = [2, 0], sizes = [1, 128], strides = [1, 1]} : vector<3x128xf32> to vector<1x128xf32>
      %49 = vector.broadcast %48 : vector<1x128xf32> to vector<8x128xf32>
      %50 = arith.addf %47, %49 : vector<8x128xf32>
      %c0_24 = arith.constant 0 : index
      %c0_25 = arith.constant 0 : index
      %51 = vector.load %arg6[%c0_24, %c0_25] : memref<8x128xf32, #tpu.memory_space<vmem>>, vector<8x128xf32>
      tpu.vector_store %arg6[%c0_24, %c0_25], %50 {strides = array<i32>} : memref<8x128xf32, #tpu.memory_space<vmem>>, vector<8x128xf32>,
    } else {
    }
    return
  }
  func.func @transform_0(%arg0: i32, %arg1: i32) -> (i32, i32) {
    %c0_i32 = arith.constant 0 : i32
    %c0_i32_0 = arith.constant 0 : i32
    %c0_i32_1 = arith.constant 0 : i32
    return %c0_i32, %c0_i32_0 : i32, i32
  }
  func.func @transform_1(%arg0: i32, %arg1: i32) -> (i32, i32) {
    %c0_i32 = arith.constant 0 : i32
    return %arg0, %arg1 : i32, i32
  }
  func.func @transform_2(%arg0: i32, %arg1: i32) -> (i32, i32) {
    %c0_i32 = arith.constant 0 : i32
    %c0_i32_0 = arith.constant 0 : i32
    return %arg1, %c0_i32 : i32, i32
  }
  func.func @transform_3(%arg0: i32, %arg1: i32) -> (i32, i32) {
    %c0_i32 = arith.constant 0 : i32
    %c0_i32_0 = arith.constant 0 : i32
    %c0_i32_1 = arith.constant 0 : i32
    return %c0_i32, %c0_i32_0 : i32, i32
  }
  func.func @transform_4(%arg0: i32, %arg1: i32) -> (i32, i32) {
    %c0_i32 = arith.constant 0 : i32
    %c0_i32_0 = arith.constant 0 : i32
    return %arg0, %c0_i32 : i32, i32
  }
}

</mosaic_0001>

<bundles_post_ra>
// kernel: tpu_custom_call.1
= control target key start
LH: loop header
LB: loop body
LE: loop exit
PB: predicated region body
PF: predicated region fallthrough
CT: control target
= control target key end

     0   :  { %s928_s0 = inlined_call_operand.<no memory space> [shape: f32[1,1], index: 0, kind: input, shape index: {}]   ;;  %s929_s1 = inlined_call_operand.hbm [shape: f32[16,32], index: 1, kind: input, shape index: {}]   ;;  %s930_s2 = inlined_call_operand.hbm [shape: f32[32,128], index: 2, kind: input, shape index: {}]   ;;  %s931_s3 = inlined_call_operand.hbm [shape: f32[3,128], index: 3, kind: input, shape index: {}]   ;;  %s932_s4 = inlined_call_operand.hbm [shape: f32[16,128], index: 4, kind: output, shape index: {}]  }
   0x1   :  { %9 = sst [smem:[#allocation3]] %s928_s0 }
   0x2   :  { %10 = vsyncpa [#allocation5], 0 }
   0x3   :  { %12 = vsyncpa [#allocation5 + $0x1], 0 }
   0x4   :  { %13 = vsyncpa [#allocation8], 0 }
   0x5   :  { %14 = vsyncpa [#allocation6], 0 }
   0x6   :  { %16 = vsyncpa [#allocation6 + $0x1], 0  ;;  %s780_s17 = smov 0   ;;  %s782_s18 = smov 0  }
   0x7   :  { %s784_s19 = smov 0   ;;  %s786_s20 = smov 0  }
   0x8   :  { %s788_s21 = smov 0   ;;  %s790_s22 = smov 0  }
   0x9 LB: > { %s465_s0 = sadd.s32 4294967295, %s746_s22   ;;  %p467_p0 = scmp.ge.s32.totalorder %s746_s22, 1  ;;  %s746_s22 = sphi %s790_s22, %s22_s22   ;;  %s742_s21 = sphi %s788_s21, %s942_s21   ;;  %s738_s20 = sphi %s786_s20, %s941_s20   ;;  %s734_s19 = sphi %s784_s19, %s940_s19   ;;  %s730_s18 = sphi %s782_s18, %s939_s18   ;;  %s726_s17 = sphi %s780_s17, %s938_s17  }
   0xa   : > { %p814_p1 = scmp.eq.s32.totalorder %s465_s0, 0  ;;  %p161_p2 = scmp.lt.s32.totalorder %s746_s22, 3 }
   0xb   : > { %s178_s26 = sshll.u32 %s930_s2, 4  ;;  %s748_s28 = smov [#allocation7]   ;;  %s179_s26 = int_to_ptr.hbm [resolvable:$true] %s178_s26 }
   0xc   : > { %p822_p3 = pnand %p467_p0, %p161_p2  ;;  %s180_s29 = sshll.u32 %s748_s28, 4  ;;  %s181_s29 = int_to_ptr.vmem [resolvable:$true] %s180_s29 }
   0xd   : > { %p470_p6 = scmp.ge.s32.totalorder %s746_s22, 2  ;;  %s193_s6 = sshll.u32 %s931_s3, 4  ;;  %s194_s6 = int_to_ptr.hbm [resolvable:$true] %s193_s6 }
   0xe   : > { %p495_p4 = pneg %p822_p3  ;;  %s749_s7 = smov 128  }
   0xf   : > { %s750_s8 = smov 8   ;;  %s751_s9 = smov [#allocation9]  }
  0x10   : > { %p496_p5 = pnand %p495_p4, %p814_p1  ;;  %s195_s10 = sshll.u32 %s751_s9, 4  ;;  %s196_s10 = int_to_ptr.vmem [resolvable:$true] %s195_s10 }
  0x11   : > { %s34_s11 = sadd.s32 1, %s742_s21  ;;  %s466_s12 = sadd.s32 4294967294, %s746_s22  }
  0x12   : > { %498 = dma.hbm_to_vmem [thread:$0]  (!%p496_p5), %s179_s26, 512, %s181_s29, [#allocation8], %s749_s7, %s749_s7, %s750_s8  }
  0x13   : > { %501 = dma.hbm_to_vmem [thread:$0]  (!%p496_p5), %s194_s6, 64, %s196_s10, [#allocation8]  }
  0x14   : > { %p36_p7 = scmp.ge.s32.totalorder %s34_s11, 2  ;;  %s64_s13 = sadd.s32 1, %s734_s19 }
  0x15   : > { %p71_p8 = scmp.ne.s32.totalorder %s734_s19, %s730_s18  ;;  %p72_p9 = scmp.eq.s32.totalorder %s746_s22, 0 }
  0x16   : > { %s944_s11 = smov (%p36_p7, %s34_s11), 0  ;;  %p77_p10 = scmp.ne.s32.totalorder %s730_s18, %s726_s17 }
  0x17   : > { %s59_s14 = ssub.s32 %s742_s21, %s944_s11  ;;  %p148_p11 = scmp.eq.s32.totalorder %s465_s0, 1 }
  0x18   : > { %p62_p12 = scmp.eq.s32.totalorder %s59_s14, 0  ;;  %p850_p13 = por %p814_p1, %p77_p10 }
  0x19   : > { %p854_p0 = por %p148_p11, %p71_p8  ;;  %p154_p2 = scmp.eq.s32.totalorder %s466_s12, 1 }
  0x1a   : > { %s859_s24 = scalar_select %p62_p12, %s734_s19, %s64_s13  }
  0x1b   : > { %p73_p4 = por %p72_p9, %p71_p8  ;;  %p861_p5 = por %p154_p2, %p77_p10 }
  0x1c   : > { %s206_s26 = sand.u32 1, %s734_s19   ;;  %s472_s0 = sshll.u32 %s742_s21, 3 }
  0x1d   : > { %p512_p7 = scmp.lt.s32.totalorder %s746_s22, 2  ;;  %s471_s28 = sshll.u32 %s206_s26, 3 }
  0x1e   : > { %s215_s5 = scalar_lea.hbm %s929_s1, %s472_s0  ;;  %s210_s7 = scalar_lea.vmem [#allocation4], %s471_s28 }
  0x1f   : > { %s217_s6 = sshll.u32 %s215_s5, 4  ;;  %s219_s8 = sshll.u32 %s210_s7, 4  ;;  %s218_s6 = int_to_ptr.hbm [resolvable:$true] %s217_s6  ;;  %s220_s8 = int_to_ptr.vmem [resolvable:$true] %s219_s8 }
  0x20   : > { %p503_p11 = pnand %p512_p7, %p73_p4  ;;  %s207_s9 = scalar_lea.sflag [#allocation5], %s206_s26 }
  0x21   : > { %228 = sbr.rel (%p822_p3) target bundleno = 453 (0x1c5), region = 36  ;;  %s874_s10 = sand.u32 (!%p822_p3), 1, %s730_s18  }
  0x22   : > { %505 = dma.hbm_to_vmem [thread:$0]  (!%p503_p11), %s218_s6, 128, %s220_s8, %s207_s9  }
  0x23   : > { %s474_s12 = sshll.u32 (!%p822_p3), %s874_s10, 3  ;;  %s231_s13 = scalar_lea.sflag (!%p822_p3), [#allocation5], %s874_s10 }
  0x24   : > { %s234_s14 = scalar_lea.vmem (!%p822_p3), [#allocation4], %s474_s12 }
  0x26   : > { %713 = dma.done.wait (%p850_p13), %s231_s13, 128  }
  0x27   : > { %715 = vsyncadd (%p850_p13), %s231_s13, 4294967168 }
  0x28   : > { %717 = dma.done.wait (%p814_p1), [#allocation8], 576  }
  0x29   : > { %719 = vsyncadd (%p814_p1), [#allocation8], 4294966720  ;;  %v281_v0 = vld [vmem:[#allocation7 + $0x18] sm:$0xff]  ;;  %v280_v1 = vld [vmem:[#allocation7 + $0x10] sm:$0xff]  ;;  %vm282_vm0 = vcmask 261120   ;;  %s315_s27 = sld [smem:[#allocation3]] }
  0x2a   : > { %298 = vmatpush.msra.mxu0 %v281_v0  ;;  %v279_v2 = vld [vmem:[#allocation7 + $0x8] sm:$0xff]  ;;  %v278_v3 = vld [vmem:[#allocation7] sm:$0xff]  ;;  %v277_v4 = vld [vmem:[%s234_s14] sm:$0xff]  ;;  %s480_s23 = sshll.u32 %s738_s20, 3  ;;  %s269_s28 = scalar_lea.vmem [#allocation10], %s474_s12 }
  0x2b   : > { %v311_v5 = vld [vmem:[#allocation9] sm:$0x7]  ;;  %s360_s0 = scalar_lea.hbm %s932_s4, %s480_s23  ;;  %s362_s29 = sshll.u32 %s269_s28, 4  ;;  %s363_s29 = int_to_ptr.vmem [resolvable:$true] %s362_s29 }
  0x2c   : > { %299 = vmatpush.msra.mxu0 %v280_v1  ;;  %v313_v6 = vperm.slane %v311_v5, 0  ;;  %v344_v29 = vperm.slane %v311_v5, 1  ;;  %v346_v31 = vperm.slane %v311_v5, 2  ;;  %s364_s30 = sshll.u32 %s360_s0, 4  ;;  %s350_s20 = scalar_lea.sflag [#allocation6], %s874_s10  ;;  %s365_s30 = int_to_ptr.hbm [resolvable:$true] %s364_s30 }
  0x2d   : > { %s674_s5 = sshra.s32 %s365_s30, 4  ;;  %s680_s9 = scalar_lea.hbm %s932_s4, 16  ;;  %s675_s5 = int_to_ptr.hbm [resolvable:$true] %s674_s5 }
  0x2e   : > { %300 = vmatpush.msra.mxu0 %v279_v2  ;;  %s676_s6 = scalar_lea.hbm %s675_s5, 8  ;;  %p681_p9 = scmp.lt.s32.totalorder %s675_s5, %s932_s4 }
  0x2f   : > { %v317_v8 = vstv %s315_s27  ;;  %p677_p1 = scmp.ne.s32.totalorder %s675_s5, %s676_s6  ;;  %p682_p10 = scmp.lt.s32.totalorder %s680_s9, %s676_s6 }
  0x30   : > { %301 = vmatpush.msra.mxu0 %v278_v3 }
  0x31   : > { %478 = vmatmul.msk.f32.vlgmr.msra.gmra.mxu0 %vm282_vm0, %v277_v4  ;;  %p678_p3 = pnand %p677_p1, %p854_p0  ;;  %p683_p12 = por %p682_p10, %p681_p9 }
  0x33   : > { %p679_p8 = pneg %p678_p3 }
  0x35   : > { %p684_p13 = pnand %p683_p12, %p679_p8 }
  0xae   : > { %v303_v7 = vpop.f32.mrf.mxu0 }
  0xaf   : > { %v314_v9 = vadd.f32 %v313_v6, %v303_v7 }
  0xb1   : > { %vm316_vm1 = vcmp.ge.f32.partialorder %v314_v9, 0.0  ;;  %v318_v10 = vmul.f32 %v317_v8, %v314_v9 }
  0xb3   : > { %v319_v11 = vsel %vm316_vm1, %v314_v9, %v318_v10 }
  0xb4   : > { %320 = vadd.xlane.f32.xlu0 %v319_v11 }
 0x127   : > { %v321_v12 = vpop.xlane.xlu0 %320 }
 0x128   : > { %v322_v13 = vmul.f32 0.015625, %v321_v12 }
 0x12a   : > { %v323_v14 = vsub.f32 %v319_v11, %v322_v13  ;;  %v327_v16 = vmul.f32 %v322_v13, %v322_v13 }
 0x12c   : > { %v324_v15 = vmul.f32 %v323_v14, %v323_v14  ;;  %v328_v17 = vmul.f32 64.0, %v327_v16 }
 0x12e   : > { %325 = vadd.xlane.f32.xlu0 %v324_v15 }
 0x1a1   : > { %v326_v18 = vpop.xlane.xlu0 %325 }
 0x1a2   : > { %v329_v19 = vsub.f32 %v326_v18, %v328_v17 }
 0x1a4   : > { %v330_v20 = vmul.f32 0.015625, %v329_v19 }
 0x1a6   : > { %v331_v21 = vmax.f32 %v330_v20, 0.0 }
 0x1a8   : > { %v332_v22 = vadd.f32 1e-05, %v331_v21 }
 0x1aa   : > { %568 = vrsqrt.f32 %v332_v22  ;;  %vm339_vm3 = vweird.f32 %v332_v22 }
 0x1b0   : > { %v569_v23 = vpop.eup %568 }
 0x1b1   : > { %v334_v24 = vmul.f32 %v569_v23, %v332_v22  ;;  %vm340_vm2 = vweird.f32 %v569_v23 }
 0x1b2   : > { %vm341_vm4 = vmor %vm339_vm3, %vm340_vm2 }
 0x1b3   : > { %v335_v25 = vmul.f32 %v569_v23, %v334_v24 }
 0x1b5   : > { %v336_v26 = vmul.f32 0.5, %v335_v25 }
 0x1b7   : > { %v337_v27 = vsub.f32 1.5, %v336_v26 }
 0x1b9   : > { %v338_v28 = vmul.f32 %v569_v23, %v337_v27 }
 0x1bb   : > { %v342_v30 = vsel %vm341_vm4, %v569_v23, %v338_v28 }
 0x1bc   : > { %v343_v32 = vmul.f32 %v342_v30, %v323_v14 }
 0x1be   : > { %v345_v33 = vmul.f32 %v344_v29, %v343_v32 }
 0x1c0   : > { %v347_v34 = vadd.f32 %v346_v31, %v345_v33 }
 0x1c2   : > { %348 = vst [vmem:[%s269_s28] sm:$0xff] %v347_v34 }
 0x1c3   : > { %687 = shalt.err (!%p684_p13)
}
 0x1c4   : > { %493 = dma.vmem_to_hbm [thread:$0]  (%p854_p0), %s363_s29, 128, %s365_s30, %s350_s20  }
 0x1c5 PF: > { %s376_s10 = sand.u32 1, %s726_s17   ;;  %p507_p2 = pnand %p470_p6, %p861_p5 }
 0x1c6   : > { %s377_s14 = scalar_lea.sflag [#allocation6], %s376_s10 }
 0x1c7   : > { %p508_p4 = pneg %p507_p2 }
 0x1c9   : > { %721 = dma.done.wait (%p508_p4), %s377_s14, 128  }
 0x1ca   : > { %723 = vsyncadd (%p508_p4), %s377_s14, 4294967168  ;;  %s22_s22 = sadd.s32 1, %s746_s22   ;;  %s938_s17 = smov %s730_s18 }
 0x1cb   : > { %p19_p7 = scmp.ge.s32.totalorder %s22_s22, 4   ;;  %s939_s18 = smov %s734_s19 }
 0x1cc   : > { %s940_s19 = smov %s859_s24  ;;  %s941_s20 = smov %s742_s21 }
 0x1cd   : > { %s942_s21 = smov %s944_s11  ;;  %21 = sbr.rel (!%p19_p7) target bundleno = 9 (0x9), region = 98 }
 0x1d2   :  { %383 = vsyncpa [#allocation5], 1 }
 0x1d3   :  { %385 = vsyncpa [#allocation5 + $0x1], 1 }
 0x1d4   :  { %386 = vsyncpa [#allocation8], 1 }
 0x1d5   :  { %387 = vsyncpa [#allocation6], 1 }
 0x1d6   :  { %389 = vsyncpa [#allocation6 + $0x1], 1 }

</bundles_post_ra>
